<compile_context>
chip_gen: v5e
topology: v5e:2x2
jax: 0.10.0
libtpu: 0.0.40
codegen_flags: <defaults>
</compile_context>

<pallas_src>
import functools

import jax
import jax.numpy as jnp
from jax import lax
from jax.experimental import pallas as pl
from jax.experimental.pallas import tpu as pltpu


# --------------------------------------------------------------------------
# Kernels
# --------------------------------------------------------------------------
def _ca_fused_kernel(x_ref, w1_ref, b1_ref, w2_ref, b2_ref, o_ref, *, inv_hw):
    """Single-pass CALayer for one batch element.

    x block: (1, C, HW) resident slab (native dtype), spatial axis on lanes.
    w1: (Cr, C)  b1: (Cr, 1)  w2: (C, Cr)  b2: (C, 1)  (tiny f32 residents)
    """
    xf = x_ref[...].astype(jnp.float32)                       # (1, C, HW)
    y = jnp.sum(xf, axis=-1, keepdims=True)[0] * inv_hw       # (C, 1) spatial mean
    h = jnp.dot(w1_ref[...], y, preferred_element_type=jnp.float32) + b1_ref[...]
    h = jnp.maximum(h, 0.0)                                    # relu, (Cr, 1)
    a = jnp.dot(w2_ref[...], h, preferred_element_type=jnp.float32) + b2_ref[...]
    att = 1.0 / (1.0 + jnp.exp(-a))                            # sigmoid, (C, 1)
    o_ref[...] = (xf * att[None, :, :]).astype(o_ref.dtype)


def _pool_kernel(x_ref, o_ref, *, hw, thw, inv_hw):
    """Per-(batch, channel) spatial mean with f32 accumulator.

    x block: (1, C, THW) spatial tile on lanes; o block: (1, C, 1) resident
    across the spatial-tile grid axis.  Tail tile (hw % thw != 0) is masked.
    """
    @pl.when(pl.program_id(1) == 0)
    def _init():
        o_ref[...] = jnp.zeros_like(o_ref)

    xf = x_ref[...].astype(jnp.float32)
    if hw % thw != 0:  # static: mask garbage lanes of the partial tail block
        lane = lax.broadcasted_iota(jnp.int32, xf.shape, dimension=2)
        valid = (pl.program_id(1) * thw + lane) < hw
        xf = jnp.where(valid, xf, 0.0)
    o_ref[...] += jnp.sum(xf, axis=-1, keepdims=True)

    @pl.when(pl.program_id(1) == pl.num_programs(1) - 1)
    def _finalize():
        o_ref[...] = o_ref[...] * inv_hw


def _scale_kernel(x_ref, att_ref, o_ref):
    """out = x * attention (per-batch, per-channel), lane-dense tile."""
    o_ref[...] = (x_ref[...].astype(jnp.float32) * att_ref[...]).astype(o_ref.dtype)


# --------------------------------------------------------------------------
# VMEM budgeting (generation-aware)
# --------------------------------------------------------------------------
def _tpu_vmem_capacity_bytes():
    try:
        info = pltpu.get_tpu_info()
        for name in ("vmem_capacity_bytes", "vmem_bytes", "vmem_size_bytes"):
            v = getattr(info, name, None)
            if v:
                return int(v)
    except Exception:
        pass
    return 64 << 20  # conservative fallback (v7x per-TensorCore VMEM)


# --------------------------------------------------------------------------
# Wrapper
# --------------------------------------------------------------------------
def ca_forward(params, x_nchw, *, force_two_pass=False, tile_elems_override=None):
    n, c, h, w = x_nchw.shape
    hw = h * w
    dtype = x_nchw.dtype
    itemsize = jnp.dtype(dtype).itemsize
    xr = x_nchw.reshape(n, c, hw)                      # free reshape, no transpose

    cr = params["conv1_w"].shape[0]
    w1 = params["conv1_w"].reshape(cr, c).astype(jnp.float32)
    b1 = params["conv1_b"].reshape(cr).astype(jnp.float32)
    w2 = params["conv2_w"].reshape(c, cr).astype(jnp.float32)
    b2 = params["conv2_b"].reshape(c).astype(jnp.float32)

    vmem_cap = _tpu_vmem_capacity_bytes()
    # Leave ~25% headroom for compiler scratch; 96 MiB cap on v5e/v6e, ~48 MiB on v7x.
    vmem_limit = int(min(vmem_cap * 3 // 4, 96 << 20))

    # ---- Fused single-pass path: x read from HBM exactly once -----------------
    slab_bytes = c * hw * itemsize
    fused_ok = (not force_two_pass) and (4 * slab_bytes + (1 << 20) <= vmem_limit)

    if fused_ok:
        cost = pl.CostEstimate(
            flops=2 * n * c * hw + 4 * n * c * cr,
            transcendentals=n * c,
            bytes_accessed=2 * n * c * hw * itemsize)
        out = pl.pallas_call(
            functools.partial(_ca_fused_kernel, inv_hw=1.0 / hw),
            out_shape=jax.ShapeDtypeStruct((n, c, hw), dtype),
            grid=(n,),
            in_specs=[
                pl.BlockSpec((1, c, hw), lambda b: (b, 0, 0)),   # x slab
                pl.BlockSpec((cr, c), lambda b: (0, 0)),          # w1
                pl.BlockSpec((cr, 1), lambda b: (0, 0)),          # b1
                pl.BlockSpec((c, cr), lambda b: (0, 0)),          # w2
                pl.BlockSpec((c, 1), lambda b: (0, 0)),           # b2
            ],
            out_specs=pl.BlockSpec((1, c, hw), lambda b: (b, 0, 0)),
            compiler_params=pltpu.CompilerParams(
                dimension_semantics=("parallel",),
                vmem_limit_bytes=vmem_limit),
            cost_estimate=cost,
        )(xr, w1, b1.reshape(cr, 1), w2, b2.reshape(c, 1))
        return out.reshape(n, c, h, w)

    # ---- Two-pass path: pool-reduce, tiny MLP in plain JAX, rescale ------------
    if tile_elems_override is not None:
        thw = min(int(tile_elems_override), hw)
    else:
        tile_bytes = min(vmem_limit // 6, 6 << 20)     # x tile; scale pass holds ~4x
        thw = tile_bytes // (c * itemsize)
    if thw >= hw:
        thw, n_tiles = hw, 1
    else:
        thw = max(128, (thw // 128) * 128)             # lane-aligned tile
        n_tiles = pl.cdiv(hw, thw)

    pooled = pl.pallas_call(
        functools.partial(_pool_kernel, hw=hw, thw=thw, inv_hw=1.0 / hw),
        out_shape=jax.ShapeDtypeStruct((n, c, 1), jnp.float32),
        grid=(n, n_tiles),
        in_specs=[pl.BlockSpec((1, c, thw), lambda b, i: (b, 0, i))],
        out_specs=pl.BlockSpec((1, c, 1), lambda b, i: (b, 0, 0)),
        compiler_params=pltpu.CompilerParams(
            dimension_semantics=("parallel", "arbitrary"),
            vmem_limit_bytes=vmem_limit),
        cost_estimate=pl.CostEstimate(
            flops=n * c * hw, transcendentals=0,
            bytes_accessed=n * c * hw * itemsize + n * c * 4),
    )(xr)

    # Squeeze-excite MLP: tiny (N, C) matmuls, run once in plain JAX (hoisted
    # out of the per-spatial-tile kernel).
    y = pooled[:, :, 0]                                                  # (N, C)
    h1 = jax.nn.relu(jnp.dot(y, w1.T, precision=lax.Precision.HIGHEST) + b1)
    att = jax.nn.sigmoid(jnp.dot(h1, w2.T, precision=lax.Precision.HIGHEST) + b2)
    att = att[:, :, None].astype(jnp.float32)                            # (N, C, 1)

    out = pl.pallas_call(
        _scale_kernel,
        out_shape=jax.ShapeDtypeStruct((n, c, hw), dtype),
        grid=(n, n_tiles),
        in_specs=[pl.BlockSpec((1, c, thw), lambda b, i: (b, 0, i)),
                  pl.BlockSpec((1, c, 1), lambda b, i: (b, 0, 0))],
        out_specs=pl.BlockSpec((1, c, thw), lambda b, i: (b, 0, i)),
        compiler_params=pltpu.CompilerParams(
            dimension_semantics=("parallel", "parallel"),
            vmem_limit_bytes=vmem_limit),
        cost_estimate=pl.CostEstimate(
            flops=n * c * hw, transcendentals=0,
            bytes_accessed=2 * n * c * hw * itemsize + n * c * 4),
    )(xr, att)
    return out.reshape(n, c, h, w)


# --------------------------------------------------------------------------
# Parameters (PyTorch Conv2d OIHW layout) and pure-JAX reference
# --------------------------------------------------------------------------
def init_ca_params(key, n_feats, reduction=8):
    cr = n_feats // reduction
    k1, k2, k3, k4 = jax.random.split(key, 4)
    return {
        "conv1_w": 0.1 * jax.random.normal(k1, (cr, n_feats, 1, 1), jnp.float32),
        "conv1_b": 0.05 * jax.random.normal(k2, (cr,), jnp.float32),
        "conv2_w": 0.1 * jax.random.normal(k3, (n_feats, cr, 1, 1), jnp.float32),
        "conv2_b": 0.05 * jax.random.normal(k4, (n_feats,), jnp.float32),
    }


def ca_reference(params, x):
    n, c, h, w = x.shape
    cr = params["conv1_w"].shape[0]
    y = jnp.mean(x.astype(jnp.float32), axis=(2, 3))                   # (N, C)
    w1 = params["conv1_w"].reshape(cr, c)
    w2 = params["conv2_w"].reshape(c, cr)
    h1 = jax.nn.relu(jnp.dot(y, w1.T, precision=lax.Precision.HIGHEST)
                     + params["conv1_b"])
    att = jax.nn.sigmoid(jnp.dot(h1, w2.T, precision=lax.Precision.HIGHEST)
                         + params["conv2_b"])
    return x.astype(jnp.float32) * att[:, :, None, None]


if __name__ == "__main__":
    key = jax.random.PRNGKey(0)
    kx1, kx2, kp = jax.random.split(key, 3)
    n_feats, reduction = 16, 8
    params = init_ca_params(kp, n_feats, reduction)

    # Case 1: fused single-pass path (f32).
    x1 = jax.random.normal(kx1, (2, n_feats, 16, 16), jnp.float32)
    out1 = jax.block_until_ready(ca_forward(params, x1))
    ref1 = ca_reference(params, x1)
    err1 = float(jnp.max(jnp.abs(out1 - ref1)))
    assert out1.shape == x1.shape and out1.dtype == x1.dtype
    assert bool(jnp.all(jnp.isfinite(out1))) and err1 < 1e-3, err1

    # Case 2: two-pass path, non-128-divisible H*W -> masked tail tile.
    x2 = jax.random.normal(kx2, (2, n_feats, 18, 18), jnp.float32)
    out2 = jax.block_until_ready(
        ca_forward(params, x2, force_two_pass=True, tile_elems_override=128))
    ref2 = ca_reference(params, x2)
    err2 = float(jnp.max(jnp.abs(out2 - ref2)))
    assert out2.shape == x2.shape and out2.dtype == x2.dtype
    assert bool(jnp.all(jnp.isfinite(out2))) and err2 < 1e-3, err2

    # Case 3: bf16 I/O preserved end-to-end (compute in f32 in-register).
    xb = x1.astype(jnp.bfloat16)
    outb = jax.block_until_ready(ca_forward(params, xb))
    refb = ca_reference(params, xb)
    errb = float(jnp.max(jnp.abs(outb.astype(jnp.float32) - refb)))
    assert outb.dtype == jnp.bfloat16 and outb.shape == xb.shape
    assert bool(jnp.all(jnp.isfinite(outb.astype(jnp.float32)))) and errb < 5e-2, errb

    print("KERNEL_OK")
</pallas_src>

<mosaic_0001>
module attributes {stable_mosaic.version = 11 : i64} {
  func.func @_ca_fused_kernel(%arg0: i32, %arg1: memref<1x16x256xf32, #tpu.memory_space<vmem>>, %arg2: memref<2x16xf32, #tpu.memory_space<vmem>>, %arg3: memref<2x1xf32, #tpu.memory_space<vmem>>, %arg4: memref<16x2xf32, #tpu.memory_space<vmem>>, %arg5: memref<16x1xf32, #tpu.memory_space<vmem>>, %arg6: memref<1x16x256xf32, #tpu.memory_space<vmem>>) attributes {dimension_semantics = [#tpu.dimension_semantics<parallel>], iteration_bounds = array<i64: 2>, scalar_prefetch = 0 : i64, scratch_operands = 0 : i64, tpu.core_type = #tpu.core_type<tc>, window_params = [{transform_indices = @transform_0, window_bounds = array<i64: 1, 16, 256>}, {pipeline_mode = #tpu.pipeline_mode<synchronous>, transform_indices = @transform_1, window_bounds = array<i64: 2, 16>}, {pipeline_mode = #tpu.pipeline_mode<synchronous>, transform_indices = @transform_2, window_bounds = array<i64: 2, 1>}, {pipeline_mode = #tpu.pipeline_mode<synchronous>, transform_indices = @transform_3, window_bounds = array<i64: 16, 2>}, {pipeline_mode = #tpu.pipeline_mode<synchronous>, transform_indices = @transform_4, window_bounds = array<i64: 16, 1>}, {transform_indices = @transform_5, window_bounds = array<i64: 1, 16, 256>}]} {
    %c0 = arith.constant 0 : index
    %c0_0 = arith.constant 0 : index
    %c0_1 = arith.constant 0 : index
    %0 = vector.load %arg1[%c0, %c0_0, %c0_1] : memref<1x16x256xf32, #tpu.memory_space<vmem>>, vector<1x16x256xf32>
    %cst = arith.constant dense<0.000000e+00> : vector<1x16xf32>
    %1 = vector.multi_reduction <add>, %0, %cst [2] : vector<1x16x256xf32> to vector<1x16xf32>
    %2 = vector.shape_cast %1 : vector<1x16xf32> to vector<1x16x1xf32>
    %3 = vector.shape_cast %2 : vector<1x16x1xf32> to vector<16x1xf32>
    %cst_2 = arith.constant 3.906250e-03 : f32
    %4 = vector.broadcast %cst_2 : f32 to vector<16x1xf32>
    %5 = arith.mulf %3, %4 : vector<16x1xf32>
    %c0_3 = arith.constant 0 : index
    %c0_4 = arith.constant 0 : index
    %6 = vector.load %arg2[%c0_3, %c0_4] : memref<2x16xf32, #tpu.memory_space<vmem>>, vector<2x16xf32>
    %cst_5 = arith.constant dense<0.000000e+00> : vector<2x1xf32>
    %7 = tpu.matmul %6, %5, %cst_5 {dimension_numbers = #tpu.dot_dimension_numbers<[1], [0], [0], [1], [0, 0, 1, 1], [], []>} : vector<2x16xf32>, vector<16x1xf32>, vector<2x1xf32> -> vector<2x1xf32>
    %c0_6 = arith.constant 0 : index
    %c0_7 = arith.constant 0 : index
    %8 = vector.load %arg3[%c0_6, %c0_7] : memref<2x1xf32, #tpu.memory_space<vmem>>, vector<2x1xf32>
    %9 = arith.addf %7, %8 : vector<2x1xf32>
    %cst_8 = arith.constant 0.000000e+00 : f32
    %10 = vector.broadcast %cst_8 : f32 to vector<2x1xf32>
    %11 = arith.maximumf %9, %10 : vector<2x1xf32>
    %c0_9 = arith.constant 0 : index
    %c0_10 = arith.constant 0 : index
    %12 = vector.load %arg4[%c0_9, %c0_10] : memref<16x2xf32, #tpu.memory_space<vmem>>, vector<16x2xf32>
    %cst_11 = arith.constant dense<0.000000e+00> : vector<16x1xf32>
    %13 = tpu.matmul %12, %11, %cst_11 {dimension_numbers = #tpu.dot_dimension_numbers<[1], [0], [0], [1], [0, 0, 1, 1], [], []>} : vector<16x2xf32>, vector<2x1xf32>, vector<16x1xf32> -> vector<16x1xf32>
    %c0_12 = arith.constant 0 : index
    %c0_13 = arith.constant 0 : index
    %14 = vector.load %arg5[%c0_12, %c0_13] : memref<16x1xf32, #tpu.memory_space<vmem>>, vector<16x1xf32>
    %15 = arith.addf %13, %14 : vector<16x1xf32>
    %cst_14 = arith.constant 0.000000e+00 : f32
    %16 = vector.broadcast %cst_14 : f32 to vector<16x1xf32>
    %17 = arith.subf %16, %15 : vector<16x1xf32>
    %18 = math.exp %17 : vector<16x1xf32>
    %cst_15 = arith.constant 1.000000e+00 : f32
    %19 = vector.broadcast %cst_15 : f32 to vector<16x1xf32>
    %20 = arith.addf %19, %18 : vector<16x1xf32>
    %cst_16 = arith.constant 1.000000e+00 : f32
    %21 = vector.broadcast %cst_16 : f32 to vector<16x1xf32>
    %22 = arith.divf %21, %20 : vector<16x1xf32>
    %23 = vector.shape_cast %22 : vector<16x1xf32> to vector<1x16x1xf32>
    %24 = vector.broadcast %23 : vector<1x16x1xf32> to vector<1x16x256xf32>
    %25 = arith.mulf %0, %24 : vector<1x16x256xf32>
    %c0_17 = arith.constant 0 : index
    %c0_18 = arith.constant 0 : index
    %c0_19 = arith.constant 0 : index
    %26 = vector.load %arg6[%c0_17, %c0_18, %c0_19] : memref<1x16x256xf32, #tpu.memory_space<vmem>>, vector<1x16x256xf32>
    tpu.vector_store %arg6[%c0_17, %c0_18, %c0_19], %25 {strides = array<i32>} : memref<1x16x256xf32, #tpu.memory_space<vmem>>, vector<1x16x256xf32>,
    return
  }
  func.func @transform_0(%arg0: i32) -> (i32, i32, i32) {
    %c0_i32 = arith.constant 0 : i32
    %c0_i32_0 = arith.constant 0 : i32
    %c0_i32_1 = arith.constant 0 : i32
    return %arg0, %c0_i32, %c0_i32_0 : i32, i32, i32
  }
  func.func @transform_1(%arg0: i32) -> (i32, i32) {
    %c0_i32 = arith.constant 0 : i32
    %c0_i32_0 = arith.constant 0 : i32
    %c0_i32_1 = arith.constant 0 : i32
    return %c0_i32, %c0_i32_0 : i32, i32
  }
  func.func @transform_2(%arg0: i32) -> (i32, i32) {
    %c0_i32 = arith.constant 0 : i32
    %c0_i32_0 = arith.constant 0 : i32
    %c0_i32_1 = arith.constant 0 : i32
    return %c0_i32, %c0_i32_0 : i32, i32
  }
  func.func @transform_3(%arg0: i32) -> (i32, i32) {
    %c0_i32 = arith.constant 0 : i32
    %c0_i32_0 = arith.constant 0 : i32
    %c0_i32_1 = arith.constant 0 : i32
    return %c0_i32, %c0_i32_0 : i32, i32
  }
  func.func @transform_4(%arg0: i32) -> (i32, i32) {
    %c0_i32 = arith.constant 0 : i32
    %c0_i32_0 = arith.constant 0 : i32
    %c0_i32_1 = arith.constant 0 : i32
    return %c0_i32, %c0_i32_0 : i32, i32
  }
  func.func @transform_5(%arg0: i32) -> (i32, i32, i32) {
    %c0_i32 = arith.constant 0 : i32
    %c0_i32_0 = arith.constant 0 : i32
    %c0_i32_1 = arith.constant 0 : i32
    return %arg0, %c0_i32, %c0_i32_0 : i32, i32, i32
  }
}

</mosaic_0001>

<bundles_post_ra>
// kernel: tpu_custom_call.1
= control target key start
LH: loop header
LB: loop body
LE: loop exit
PB: predicated region body
PF: predicated region fallthrough
CT: control target
= control target key end

     0   :  { %10 = vsyncpa [#allocation3], 0  ;;  %s847_s0 = inlined_call_operand.hbm [shape: f32[2,16,256], index: 0, kind: input, shape index: {}]   ;;  %s848_s1 = inlined_call_operand.vmem [shape: f32[2,16], index: 1, kind: input, shape index: {}]   ;;  %s849_s2 = inlined_call_operand.vmem [shape: f32[2,1], index: 2, kind: input, shape index: {}]   ;;  %s850_s3 = inlined_call_operand.vmem [shape: f32[16,2], index: 3, kind: input, shape index: {}]   ;;  %s851_s4 = inlined_call_operand.vmem [shape: f32[16,1], index: 4, kind: input, shape index: {}]   ;;  %s852_s5 = inlined_call_operand.hbm [shape: f32[2,16,256], index: 5, kind: output, shape index: {}]  }
   0x1   :  { %12 = vsyncpa [#allocation3 + $0x1], 0 }
   0x2   :  { %13 = vsyncpa [#allocation4], 0 }
   0x3   :  { %15 = vsyncpa [#allocation4 + $0x1], 0  ;;  %s682_s18 = smov 0   ;;  %s684_s19 = smov 0  }
   0x4   :  { %s686_s20 = smov 0   ;;  %s688_s21 = smov 0  }
   0x5 LB: > { %s703_s22 = sadd.s32 4294967295, %s645_s21   ;;  %s467_s23 = sadd.s32 4294967294, %s645_s21   ;;  %s645_s21 = sphi %s688_s21, %s862_s21   ;;  %s641_s20 = sphi %s686_s20, %s861_s20   ;;  %s637_s19 = sphi %s684_s19, %s860_s19   ;;  %s633_s18 = sphi %s682_s18, %s859_s18  }
   0x6   : > { %s707_s24 = sadd.s32 1, %s645_s21   ;;  %s28_s25 = sadd.s32 1, %s641_s20 }
   0x7   : > { %s25_s26 = ssub.s32 %s645_s21, %s707_s24  ;;  %p35_p0 = scmp.ne.s32.totalorder %s641_s20, %s637_s19 }
   0x8   : > { %p26_p1 = scmp.eq.s32.totalorder %s25_s26, 0  ;;  %p36_p2 = scmp.eq.s32.totalorder %s645_s21, 0 }
   0x9   : > { %p41_p3 = scmp.ne.s32.totalorder %s637_s19, %s633_s18  ;;  %p42_p4 = scmp.eq.s32.totalorder %s703_s22, 0 }
   0xa   : > { %s719_s27 = scalar_select %p26_p1, %s641_s20, %s28_s25  }
   0xb   : > { %p721_p5 = por %p36_p2, %p35_p0  ;;  %p725_p6 = por %p42_p4, %p41_p3 }
   0xc   : > { %p149_p7 = scmp.eq.s32.totalorder %s703_s22, 1  ;;  %p155_p8 = scmp.eq.s32.totalorder %s467_s23, 1 }
   0xd   : > { %p500_p10 = scmp.lt.s32.totalorder %s645_s21, 2  ;;  %s187_s7 = sand.u32 1, %s641_s20  }
   0xe   : > { %p732_p11 = por %p149_p7, %p35_p0  ;;  %p736_p12 = por %p155_p8, %p41_p3 }
   0xf   : > { %s485_s8 = sshll.u32 %s645_s21, 5  ;;  %s470_s9 = sshll.u32 %s187_s7, 5 }
  0x10   : > { %s196_s12 = scalar_lea.hbm %s847_s0, %s485_s8  ;;  %s191_s14 = scalar_lea.vmem [#allocation2], %s470_s9 }
  0x11   : > { %s197_s13 = sshll.u32 %s196_s12, 4  ;;  %s199_s15 = sshll.u32 %s191_s14, 4  ;;  %s198_s13 = int_to_ptr.hbm [resolvable:$true] %s197_s13  ;;  %s200_s15 = int_to_ptr.vmem [resolvable:$true] %s199_s15 }
  0x12   : > { %p747_p13 = pnand %p500_p10, %p721_p5  ;;  %p473_p0 = scmp.ge.s32.totalorder %s645_s21, 1 }
  0x13   : > { %p207_p1 = scmp.lt.s32.totalorder %s645_s21, 3  ;;  %s188_s17 = scalar_lea.sflag [#allocation3], %s187_s7 }
  0x14   : > { %s549_s23 = sshra.s32 %s198_s13, 4  ;;  %p553_p3 = pneg %p747_p13  ;;  %s550_s23 = int_to_ptr.hbm [resolvable:$true] %s549_s23 }
  0x15   : > { %s551_s25 = scalar_lea.hbm %s550_s23, 32  ;;  %s556_s28 = scalar_lea.hbm %s847_s0, 64 }
  0x16   : > { %p552_p2 = scmp.ne.s32.totalorder %s550_s23, %s551_s25  ;;  %p557_p5 = scmp.lt.s32.totalorder %s550_s23, %s847_s0 }
  0x17   : > { %p558_p8 = scmp.lt.s32.totalorder %s556_s28, %s551_s25 }
  0x18   : > { %p554_p4 = pnand %p553_p3, %p552_p2 }
  0x19   : > { %p559_p10 = por %p558_p8, %p557_p5 }
  0x1a   : > { %p555_p7 = pneg %p554_p4 }
  0x1c   : > { %p560_p9 = pnand %p559_p10, %p555_p7 }
  0x1e   : > { %563 = shalt.err (!%p560_p9)
}
  0x1f   : > { %s647_s7 = smov 256   ;;  %s648_s11 = smov 16  }
  0x20   : > { %495 = dma.hbm_to_vmem [thread:$0]  (!%p747_p13), %s198_s13, 512, %s200_s15, %s188_s17, %s647_s7, %s647_s7, %s648_s11  }
  0x21   : > { %p208_p2 = pnand %p473_p0, %p207_p1 }
  0x22   : > { %s768_s12 = sand.u32 (!%p208_p2), 1, %s637_s19  }
  0x23   : > { %211 = sbr.rel (%p208_p2) target bundleno = 590 (0x24e), region = 40  ;;  %s474_s14 = sshll.u32 (!%p208_p2), %s768_s12, 5 }
  0x24   : > { %s214_s23 = scalar_lea.sflag (!%p208_p2), [#allocation3], %s768_s12  ;;  %s217_s25 = scalar_lea.vmem (!%p208_p2), [#allocation2], %s474_s14 }
  0x28   : > { %624 = dma.done.wait (%p725_p6), %s214_s23, 512  }
  0x29   : > { %626 = vsyncadd (%p725_p6), %s214_s23, 4294966784  ;;  %v778_v0 = vld [vmem:[%s217_s25 + $0x10] sm:$0xff]  ;;  %v780_v1 = vld [vmem:[%s217_s25 + $0x18] sm:$0xff]  ;;  %vm259_vm0 = vcmask 130048   ;;  %vm295_vm1 = vcmask 1041408   ;;  %vm288_vm2 = vcmask 15360  }
  0x2a   : > { %v252_v2 = vadd.f32 %v780_v1, %v778_v0  ;;  %v784_v3 = vld [vmem:[%s217_s25] sm:$0xff]  ;;  %v786_v4 = vld [vmem:[%s217_s25 + $0x8] sm:$0xff]  ;;  %v649_v17 = vmov 0   ;;  %s486_s23 = sshll.u32 %s703_s22, 5  ;;  %s244_s25 = scalar_lea.vmem [#allocation5], %s474_s14 }
  0x2b   : > { %v249_v5 = vadd.f32 %v786_v4, %v784_v3  ;;  %v257_v10 = vld [vmem:[%s848_s1] sm:$0x3]  ;;  %v285_v16 = vld [vmem:[%s850_s3 + $0x8] sm:$0xff]  ;;  %539 = vset.pattern.permute.xlu1 %v649_v17  ;;  %540 = vset.pattern.permute.xlu0 %v649_v17  ;;  %s390_s15 = scalar_lea.hbm %s852_s5, %s486_s23  ;;  %s391_s16 = sshll.u32 %s244_s25, 4  ;;  %s392_s16 = int_to_ptr.vmem [resolvable:$true] %s391_s16 }
  0x2c   : > { %253 = vadd.xlane.f32.xlu0 %v252_v2  ;;  %v258_v11 = vld [vmem:[%s849_s2] sm:$0x3]  ;;  %v287_v22 = vld [vmem:[%s851_s4 + $0x8] sm:$0xff]  ;;  %s393_s17 = sshll.u32 %s390_s15, 4  ;;  %s379_s22 = scalar_lea.sflag [#allocation4], %s768_s12  ;;  %s394_s17 = int_to_ptr.hbm [resolvable:$true] %s393_s17 }
  0x2d   : > { %v284_v15 = vld [vmem:[%s850_s3] sm:$0xff]  ;;  %s593_s14 = sshra.s32 %s394_s17, 4  ;;  %s599_s9 = scalar_lea.hbm %s852_s5, 64  ;;  %s594_s14 = int_to_ptr.hbm [resolvable:$true] %s593_s14 }
  0x2e   : > { %v286_v18 = vld [vmem:[%s851_s4] sm:$0xff]  ;;  %s595_s26 = scalar_lea.hbm %s594_s14, 32  ;;  %p600_p0 = scmp.lt.s32.totalorder %s594_s14, %s852_s5 }
  0x2f   : > { %p596_p6 = scmp.ne.s32.totalorder %s594_s14, %s595_s26  ;;  %p601_p1 = scmp.lt.s32.totalorder %s599_s9, %s595_s26 }
  0x31   : > { %p597_p9 = pnand %p596_p6, %p732_p11  ;;  %p602_p3 = por %p601_p1, %p600_p0 }
  0x33   : > { %p598_p13 = pneg %p597_p9 }
  0x34   : > { %250 = vadd.xlane.f32.xlu0 %v249_v5 }
  0x35   : > { %p603_p4 = pnand %p602_p3, %p598_p13 }
  0x9f   : > { %v254_v6 = vpop.xlane.xlu0 %253 }
  0xa0   : > { %v256_v7 = vmul.f32 0.00390625, %v254_v6 }
  0xa2   : > { %277 = vmatpush.msra.mxu0 %v256_v7 }
  0xa7   : > { %v251_v8 = vpop.xlane.xlu0 %250 }
  0xa8   : > { %v255_v9 = vmul.f32 0.00390625, %v251_v8 }
  0xaa   : > { %278 = vmatpush.msra.mxu0 %v255_v9 }
  0xab   : > { %476 = vmatmul.msk.f32.vlgmr.msra.gmra.mxu0 %vm259_vm0, %v257_v10 }
 0x128   : > { %v280_v12 = vpop.f32.mrf.mxu0 }
 0x129   : > { %v281_v13 = vadd.f32 %v280_v12, %v258_v11 }
 0x12b   : > { %v283_v14 = vmax.f32 %v281_v13, 0.0 }
 0x12d   : > { %477 = vmatpush.msk.msra.mxu1 %vm295_vm1, %v283_v14  ;;  %487 = vmatpush.msk.msra.mxu2 %vm295_vm1, %v283_v14 }
 0x12e   : > { %478 = vmatmul.msk.f32.vlgmr.msra.gmra.mxu1 %vm288_vm2, %v284_v15  ;;  %479 = vmatmul.msk.f32.vlgmr.msra.gmra.mxu2 %vm288_vm2, %v285_v16 }
 0x1ab   : > { %v316_v19 = vpop.f32.mrf.mxu1 }
 0x1ac   : > { %v317_v20 = vadd.f32 %v316_v19, %v286_v18 }
 0x1ae   : > { %v322_v21 = vsub.f32 0.0, %v317_v20 }
 0x1b0   : > { %v324_v23 = vmul.f32 1.442695, %v322_v21 }
 0x1b1   : > { %v319_v24 = vpop.f32.mrf.mxu2 }
 0x1b2   : > { %541 = vpow2.f32 %v324_v23  ;;  %v320_v25 = vadd.f32 %v319_v24, %v287_v22 }
 0x1b4   : > { %v323_v26 = vsub.f32 0.0, %v320_v25 }
 0x1b6   : > { %v326_v27 = vmul.f32 1.442695, %v323_v26 }
 0x1b8   : > { %v542_v28 = vpop.eup %541  ;;  %543 = vpow2.f32 %v326_v27 }
 0x1b9   : > { %v328_v29 = vadd.f32 1.0, %v542_v28 }
 0x1bb   : > { %545 = vrcp.f32 %v328_v29  ;;  %v341_v35 = vand.u32 2147483648, %v328_v29  ;;  %v339_v37 = vand.u32 2147483647, %v328_v29  ;;  %vm335_vm4 = vweird.f32 %v328_v29 }
 0x1bd   : > { %v342_v41 = vor.u32 1.1754944e-38, %v341_v35  ;;  %vm340_vm6 = vcmp.eq.f32.partialorder %v339_v37, 8.507059e+37 }
 0x1be   : > { %v544_v30 = vpop.eup %543 }
 0x1bf   : > { %v329_v31 = vadd.f32 1.0, %v544_v30 }
 0x1c1   : > { %v546_v32 = vpop.eup %545  ;;  %547 = vrcp.f32 %v329_v31  ;;  %v356_v46 = vand.u32 2147483648, %v329_v31  ;;  %vm350_vm8 = vweird.f32 %v329_v31  ;;  %v354_v48 = vand.u32 2147483647, %v329_v31 }
 0x1c2   : > { %v331_v33 = vmul.f32 %v546_v32, %v328_v29  ;;  %vm336_vm3 = vweird.f32 %v546_v32 }
 0x1c3   : > { %vm337_vm5 = vmor %vm335_vm4, %vm336_vm3  ;;  %v357_v50 = vor.u32 1.1754944e-38, %v356_v46  ;;  %vm355_vm10 = vcmp.eq.f32.partialorder %v354_v48, 8.507059e+37 }
 0x1c4   : > { %v332_v34 = vsub.f32 1.0, %v331_v33 }
 0x1c6   : > { %v333_v36 = vmul.f32 %v546_v32, %v332_v34 }
 0x1c7   : > { %v548_v38 = vpop.eup %547 }
 0x1c8   : > { %v334_v39 = vadd.f32 %v546_v32, %v333_v36  ;;  %v346_v40 = vmul.f32 %v548_v38, %v329_v31  ;;  %vm351_vm7 = vweird.f32 %v548_v38 }
 0x1c9   : > { %vm352_vm9 = vmor %vm350_vm8, %vm351_vm7 }
 0x1ca   : > { %v338_v42 = vsel %vm337_vm5, %v546_v32, %v334_v39  ;;  %v347_v43 = vsub.f32 1.0, %v346_v40 }
 0x1cb   : > { %v343_v44 = vsel %vm340_vm6, %v342_v41, %v338_v42 }
 0x1cc   : > { %362 = vperm.xlu1 %539, %v343_v44   ;;  %v348_v45 = vmul.f32 %v548_v38, %v347_v43 }
 0x1ce   : > { %v349_v47 = vadd.f32 %v548_v38, %v348_v45 }
 0x1d0   : > { %v353_v49 = vsel %vm352_vm9, %v548_v38, %v349_v47 }
 0x1d1   : > { %v358_v51 = vsel %vm355_vm10, %v357_v50, %v353_v49 }
 0x1d4   : > { %367 = vperm.xlu1 %539, %v358_v51  }
 0x23e   : > { %v363_v52 = vpop.permute.xlu1 %362 }
 0x23f   : > { %v370_v53 = vmul.f32 %v363_v52, %v784_v3  ;;  %v371_v54 = vmul.f32 %v363_v52, %v786_v4 }
 0x241   : > { %374 = vst [vmem:[%s244_s25] sm:$0xff] %v370_v53 }
 0x242   : > { %375 = vst [vmem:[%s244_s25 + $0x8] sm:$0xff] %v371_v54 }
 0x246   : > { %v368_v55 = vpop.permute.xlu1 %367 }
 0x247   : > { %v372_v56 = vmul.f32 %v368_v55, %v778_v0  ;;  %v373_v57 = vmul.f32 %v368_v55, %v780_v1 }
 0x249   : > { %376 = vst [vmem:[%s244_s25 + $0x10] sm:$0xff] %v372_v56 }
 0x24a   : > { %377 = vst [vmem:[%s244_s25 + $0x18] sm:$0xff] %v373_v57 }
 0x24b   : > { %606 = shalt.err (!%p603_p4)
}
 0x24c   : > { %s650_s12 = smov 256   ;;  %s651_s11 = smov 16  }
 0x24d   : > { %490 = dma.vmem_to_hbm [thread:$0]  (%p732_p11), %s392_s16, 512, %s394_s17, %s379_s22, %s650_s12, %s650_s12, %s651_s11  }
 0x24e PF: > { %s408_s23 = sand.u32 1, %s633_s18   ;;  %p858_p7 = scmp.ge.s32.totalorder %s645_s21, 2 }
 0x24f   : > { %s409_s25 = scalar_lea.sflag [#allocation4], %s408_s23 }
 0x250   : > { %p497_p5 = pnand %p858_p7, %p736_p12 }
 0x252   : > { %p498_p8 = pneg %p497_p5 }
 0x254   : > { %628 = dma.done.wait (%p498_p8), %s409_s25, 512  }
 0x255   : > { %630 = vsyncadd (%p498_p8), %s409_s25, 4294966784  ;;  %p18_p10 = scmp.ge.s32.totalorder %s707_s24, 4   ;;  %s859_s18 = smov %s637_s19 }
 0x256   : > { %s860_s19 = smov %s641_s20  ;;  %s861_s20 = smov %s719_s27 }
 0x257   : > { %s862_s21 = smov %s707_s24  ;;  %20 = sbr.rel (!%p18_p10) target bundleno = 5 (0x5), region = 85 }
 0x25c   :  { %415 = vsyncpa [#allocation3], 1 }
 0x25d   :  { %417 = vsyncpa [#allocation3 + $0x1], 1 }
 0x25e   :  { %418 = vsyncpa [#allocation4], 1 }
 0x25f   :  { %420 = vsyncpa [#allocation4 + $0x1], 1 }

</bundles_post_ra>
